<compile_context>
chip_gen: v6e
topology: v6e:2x2x1
jax: 0.10.0
libtpu: 0.0.40
codegen_flags: <defaults>
</compile_context>

<pallas_src>
import functools

import jax
import jax.numpy as jnp
from jax.experimental import pallas as pl
from jax.experimental.pallas import tpu as pltpu


def _ceil_div(a, b):
    return -(-a // b)


def _round_up(a, b):
    return _ceil_div(a, b) * b


def _mixed_op_attention_kernel(x_ref, w1f_ref, w2t_ref, g_ref, out_ref, y_ref,
                               *, inv_hw):
    """Fused MixedOp + OpsAttention for one batch tile.

    x_ref  : (BT, Cp, HWp) bf16  input tile (spatial on lanes; C/HW zero-padded)
    w1f_ref: (Cp, HID)     f32   fc1 weight, transposed + group-folded
    w2t_ref: (HID, 8C)     f32   fc2 weight, transposed
    g_ref  : (8C, Cp)      f32   group-sum matrix (8 stacked identities)
    out_ref: (BT, Cp, HWp) bf16  sum over the 8 op groups of temp * y
    y_ref  : (BT, 1, 8C)   f32   SE gate y per batch row (op_attention source)
    """
    # Upcast once: v5e has no bf16 VALU/EUP, and the SE gate wants f32 anyway.
    x = x_ref[...].astype(jnp.float32)                          # (BT, Cp, HWp)

    # Global average pool (AdaptiveAvgPool2d(1)).  Padded lanes/channels are
    # zero, so summing the padded tile and dividing by the ORIGINAL H*W is
    # exact.  With identity stand-ins every op group pools to this vector.
    pooled = jnp.sum(x, axis=-1) * inv_hw                       # (BT, Cp)

    # SE MLP: relu(pool @ W1_folded) -> sigmoid(. @ W2^T).  W1^T was pre-folded
    # over the 8 identical groups in the wrapper, so this equals fc(pool(temp)).
    h = jnp.maximum(
        jnp.dot(pooled, w1f_ref[...], preferred_element_type=jnp.float32), 0.0)
    y = jax.nn.sigmoid(
        jnp.dot(h, w2t_ref[...], preferred_element_type=jnp.float32))  # (BT, 8C)

    y_ref[:, 0, :] = y                                          # tiny aux output

    # Per-channel scale = sum over the 8 op groups of y.  One small MXU matmul
    # (idle MXU slot) instead of 7 misaligned lane-slice adds.
    # TODO(synk): with real candidate ops this fold is invalid; accumulate
    #             acc += op_i(x) * y[:, i*C:(i+1)*C, None] per group instead.
    scale = jnp.dot(y, g_ref[...], preferred_element_type=jnp.float32)  # (BT, Cp)

    out_ref[...] = (x * scale[:, :, None]).astype(out_ref.dtype)


def _vmem_limits():
    """(vmem_limit_bytes, streaming-tile budget) sized per TPU generation."""
    try:
        vmem_cap = int(pltpu.get_tpu_info().vmem_capacity_bytes)
    except Exception:
        vmem_cap = 64 << 20              # v7x per-TC capacity; safe everywhere
    vmem_limit = (vmem_cap * 3) // 4     # 96 MiB v5e/v6e, 48 MiB v7x
    tile_budget = (vmem_limit * 2) // 3  # headroom for weights / f32 temporaries
    return vmem_limit, tile_budget


def _pick_batch_tiling(b, c_pad, hw_pad, tile_budget):
    """Batch-tile size + grid-step count.

    ~20 bytes per tile element: bf16 x & out, each double-buffered (8 B), plus
    f32 in-kernel upcast/product temporaries (8 B) and margin.  Grid steps are
    forced even (>= 2 when B >= 2) so the 'parallel' batch axis splits evenly
    across v7x's two TensorCores.
    """
    bytes_per_row = 20 * c_pad * hw_pad
    bt_max = max(1, tile_budget // bytes_per_row)
    if b <= 1:
        num_blocks = 1
    elif b <= 2 * bt_max:
        num_blocks = 2
    else:
        num_blocks = _ceil_div(b, bt_max)
        if num_blocks % 2:
            num_blocks += 1
    bt = _ceil_div(b, num_blocks)
    return bt, num_blocks, bt * num_blocks


@jax.jit
def mixed_op_forward(x, w1, w2):
    """MixedOp forward (identity stand-in candidate ops).

    x : (B, C, H, W)        input
    w1: (8C//8, 8C) f32     OpsAttention fc1 weight (PyTorch (out, in) layout)
    w2: (8C, 8C//8) f32     OpsAttention fc2 weight (PyTorch (out, in) layout)
    Returns (output (B, C, H, W) bf16, op_attention (8,) f32).  Output is kept
    bf16 (the kernel's I/O dtype per the perf review); cast in the caller if
    f32 is required.
    """
    b, c, h, w = x.shape
    cc = 8 * c
    hidden = cc // 8                     # ratio = 8  (== c)
    hw = h * w

    # Layout: spatial onto the lane axis, padded to lane/sublane multiples.
    c_pad = _round_up(c, 8)
    hw_pad = _round_up(hw, 128)
    vmem_limit, tile_budget = _vmem_limits()
    bt, num_blocks, b_pad = _pick_batch_tiling(b, c_pad, hw_pad, tile_budget)

    x_flat = x.reshape(b, c, hw)
    if (b_pad, c_pad, hw_pad) != (b, c, hw):
        x_flat = jnp.pad(
            x_flat, ((0, b_pad - b), (0, c_pad - c), (0, hw_pad - hw)))
    x_flat = x_flat.astype(jnp.bfloat16)

    # One-time tiny weight prep: transpose for row-major matmuls; fold fc1 over
    # the 8 identical (identity stand-in) op groups so y0 @ W1^T == pool(x) @ w1f;
    # zero rows/columns cover the padded channels.
    w1f = jnp.asarray(w1, jnp.float32).T.reshape(8, c, hidden).sum(axis=0)
    if c_pad != c:
        w1f = jnp.pad(w1f, ((0, c_pad - c), (0, 0)))             # (Cp, HID)
    w2t = jnp.asarray(w2, jnp.float32).T                         # (HID, 8C)
    g = jnp.tile(jnp.eye(c, c_pad, dtype=jnp.float32), (8, 1))   # (8C, Cp)

    elems = b_pad * c_pad * hw_pad
    cost = pl.CostEstimate(
        flops=3 * elems + 2 * b_pad * (c_pad * hidden + hidden * cc + cc * c_pad),
        transcendentals=b_pad * cc,
        bytes_accessed=2 * 2 * elems + 4 * b_pad * cc
        + 4 * (c_pad * hidden + hidden * cc + cc * c_pad),
    )

    out_flat, y_gate = pl.pallas_call(
        functools.partial(_mixed_op_attention_kernel, inv_hw=1.0 / hw),
        grid=(num_blocks,),
        in_specs=[
            pl.BlockSpec((bt, c_pad, hw_pad), lambda i: (i, 0, 0)),
            pl.BlockSpec((c_pad, hidden), lambda i: (0, 0)),
            pl.BlockSpec((hidden, cc), lambda i: (0, 0)),
            pl.BlockSpec((cc, c_pad), lambda i: (0, 0)),
        ],
        out_specs=(
            pl.BlockSpec((bt, c_pad, hw_pad), lambda i: (i, 0, 0)),
            pl.BlockSpec((bt, 1, cc), lambda i: (i, 0, 0)),
        ),
        out_shape=(
            jax.ShapeDtypeStruct((b_pad, c_pad, hw_pad), jnp.bfloat16),
            jax.ShapeDtypeStruct((b_pad, 1, cc), jnp.float32),
        ),
        compiler_params=pltpu.CompilerParams(
            dimension_semantics=("parallel",),   # megacore split on v7x
            vmem_limit_bytes=vmem_limit,
        ),
        cost_estimate=cost,
    )(x_flat, w1f, w2t, g)

    output = out_flat[:b, :c, :hw].reshape(b, c, h, w)
    # op_attention[i] = sum over batch and group-i channels of the SE gate y
    # (padded batch rows are sliced off before the reduction, so the pad can't
    # pollute the sums).
    op_attention = y_gate[:b, 0, :].reshape(b, 8, c).sum(axis=(0, 2))
    return output, op_attention


def _reference(x, w1, w2):
    """Pure-JAX f32 reference of the PyTorch forward (identity stand-in ops)."""
    b, c, _, _ = x.shape
    temp = jnp.concatenate([x] * 8, axis=1)                    # (B, 8C, H, W)
    y0 = temp.mean(axis=(2, 3))                                # (B, 8C)
    hdn = jnp.maximum(y0 @ w1.T, 0.0)
    y = jax.nn.sigmoid(hdn @ w2.T)                             # (B, 8C)
    att = temp * y[:, :, None, None]
    out = sum(att[:, i * c:(i + 1) * c] for i in range(8))
    op_att = jnp.stack([jnp.sum(y[:, i * c:(i + 1) * c]) for i in range(8)])
    return out, op_att


if __name__ == "__main__":
    key = jax.random.PRNGKey(0)
    kx, k1, k2 = jax.random.split(key, 3)

    B, C, H, W = 2, 4, 16, 16          # MixedOp channel C=4 -> attention channel 8C=32
    CC = 8 * C
    HIDDEN = CC // 8                   # ratio = 8

    x = jax.random.normal(kx, (B, C, H, W), dtype=jnp.float32)
    # nn.Linear(channel, channel//ratio, bias=False).weight: (out, in) = (HIDDEN, CC)
    w1 = 0.1 * jax.random.normal(k1, (HIDDEN, CC), dtype=jnp.float32)
    # nn.Linear(channel//ratio, channel, bias=False).weight: (out, in) = (CC, HIDDEN)
    w2 = 0.1 * jax.random.normal(k2, (CC, HIDDEN), dtype=jnp.float32)

    output, op_attention = mixed_op_forward(x, w1, w2)
    jax.block_until_ready((output, op_attention))

    assert output.shape == (B, C, H, W)
    assert op_attention.shape == (8,)

    ref_out, ref_att = _reference(x, w1, w2)
    # bf16 I/O on the streaming pass -> ~0.8% worst-case relative error.
    assert jnp.allclose(output.astype(jnp.float32), ref_out, rtol=2e-2, atol=2e-2)
    assert jnp.allclose(op_attention, ref_att, rtol=2e-2, atol=2e-2)

    print("KERNEL_OK")
</pallas_src>

<mosaic_0001>
module attributes {stable_mosaic.version = 11 : i64} {
  func.func @_mixed_op_attention_kernel(%arg0: i32, %arg1: memref<1x8x256xbf16, #tpu.memory_space<vmem>>, %arg2: memref<8x4xf32, #tpu.memory_space<vmem>>, %arg3: memref<4x32xf32, #tpu.memory_space<vmem>>, %arg4: memref<32x8xf32, #tpu.memory_space<vmem>>, %arg5: memref<1x8x256xbf16, #tpu.memory_space<vmem>>, %arg6: memref<1x1x32xf32, #tpu.memory_space<vmem>>) attributes {dimension_semantics = [#tpu.dimension_semantics<parallel>], iteration_bounds = array<i64: 2>, scalar_prefetch = 0 : i64, scratch_operands = 0 : i64, tpu.core_type = #tpu.core_type<tc>, window_params = [{transform_indices = @transform_0, window_bounds = array<i64: 1, 8, 256>}, {pipeline_mode = #tpu.pipeline_mode<synchronous>, transform_indices = @transform_1, window_bounds = array<i64: 8, 4>}, {pipeline_mode = #tpu.pipeline_mode<synchronous>, transform_indices = @transform_2, window_bounds = array<i64: 4, 32>}, {pipeline_mode = #tpu.pipeline_mode<synchronous>, transform_indices = @transform_3, window_bounds = array<i64: 32, 8>}, {transform_indices = @transform_4, window_bounds = array<i64: 1, 8, 256>}, {transform_indices = @transform_5, window_bounds = array<i64: 1, 1, 32>}]} {
    %c0 = arith.constant 0 : index
    %c0_0 = arith.constant 0 : index
    %c0_1 = arith.constant 0 : index
    %0 = vector.load %arg1[%c0, %c0_0, %c0_1] : memref<1x8x256xbf16, #tpu.memory_space<vmem>>, vector<1x8x256xbf16>
    %1 = arith.extf %0 : vector<1x8x256xbf16> to vector<1x8x256xf32>
    %cst = arith.constant dense<0.000000e+00> : vector<1x8xf32>
    %2 = vector.multi_reduction <add>, %1, %cst [2] : vector<1x8x256xf32> to vector<1x8xf32>
    %cst_2 = arith.constant 3.906250e-03 : f32
    %3 = vector.broadcast %cst_2 : f32 to vector<1x8xf32>
    %4 = arith.mulf %2, %3 : vector<1x8xf32>
    %c0_3 = arith.constant 0 : index
    %c0_4 = arith.constant 0 : index
    %5 = vector.load %arg2[%c0_3, %c0_4] : memref<8x4xf32, #tpu.memory_space<vmem>>, vector<8x4xf32>
    %cst_5 = arith.constant dense<0.000000e+00> : vector<1x4xf32>
    %6 = tpu.matmul %4, %5, %cst_5 {dimension_numbers = #tpu.dot_dimension_numbers<[1], [0], [0], [1], [0, 0, 1, 1], [], []>} : vector<1x8xf32>, vector<8x4xf32>, vector<1x4xf32> -> vector<1x4xf32>
    %cst_6 = arith.constant 0.000000e+00 : f32
    %7 = vector.broadcast %cst_6 : f32 to vector<1x4xf32>
    %8 = arith.maximumf %6, %7 : vector<1x4xf32>
    %c0_7 = arith.constant 0 : index
    %c0_8 = arith.constant 0 : index
    %9 = vector.load %arg3[%c0_7, %c0_8] : memref<4x32xf32, #tpu.memory_space<vmem>>, vector<4x32xf32>
    %cst_9 = arith.constant dense<0.000000e+00> : vector<1x32xf32>
    %10 = tpu.matmul %8, %9, %cst_9 {dimension_numbers = #tpu.dot_dimension_numbers<[1], [0], [0], [1], [0, 0, 1, 1], [], []>} : vector<1x4xf32>, vector<4x32xf32>, vector<1x32xf32> -> vector<1x32xf32>
    %11 = arith.negf %10 : vector<1x32xf32>
    %12 = math.exp %11 : vector<1x32xf32>
    %cst_10 = arith.constant 1.000000e+00 : f32
    %13 = vector.broadcast %cst_10 : f32 to vector<1x32xf32>
    %14 = arith.addf %13, %12 : vector<1x32xf32>
    %15 = arith.divf %13, %14 : vector<1x32xf32>
    %c0_11 = arith.constant 0 : index
    %c0_12 = arith.constant 0 : index
    %c0_13 = arith.constant 0 : index
    %16 = vector.load %arg6[%c0_11, %c0_12, %c0_13] : memref<1x1x32xf32, #tpu.memory_space<vmem>>, vector<1x1x32xf32>
    %17 = vector.shape_cast %16 : vector<1x1x32xf32> to vector<1x32xf32>
    %18 = vector.shape_cast %15 : vector<1x32xf32> to vector<1x1x32xf32>
    tpu.vector_store %arg6[%c0_11, %c0_12, %c0_13], %18 {strides = array<i32>} : memref<1x1x32xf32, #tpu.memory_space<vmem>>, vector<1x1x32xf32>,
    %c0_14 = arith.constant 0 : index
    %c0_15 = arith.constant 0 : index
    %19 = vector.load %arg4[%c0_14, %c0_15] : memref<32x8xf32, #tpu.memory_space<vmem>>, vector<32x8xf32>
    %cst_16 = arith.constant dense<0.000000e+00> : vector<1x8xf32>
    %20 = tpu.matmul %15, %19, %cst_16 {dimension_numbers = #tpu.dot_dimension_numbers<[1], [0], [0], [1], [0, 0, 1, 1], [], []>} : vector<1x32xf32>, vector<32x8xf32>, vector<1x8xf32> -> vector<1x8xf32>
    %21 = vector.shape_cast %20 : vector<1x8xf32> to vector<1x8x1xf32>
    %22 = vector.broadcast %21 : vector<1x8x1xf32> to vector<1x8x256xf32>
    %23 = arith.mulf %1, %22 : vector<1x8x256xf32>
    %24 = arith.truncf %23 : vector<1x8x256xf32> to vector<1x8x256xbf16>
    %c0_17 = arith.constant 0 : index
    %c0_18 = arith.constant 0 : index
    %c0_19 = arith.constant 0 : index
    %25 = vector.load %arg5[%c0_17, %c0_18, %c0_19] : memref<1x8x256xbf16, #tpu.memory_space<vmem>>, vector<1x8x256xbf16>
    tpu.vector_store %arg5[%c0_17, %c0_18, %c0_19], %24 {strides = array<i32>} : memref<1x8x256xbf16, #tpu.memory_space<vmem>>, vector<1x8x256xbf16>,
    return
  }
  func.func @transform_0(%arg0: i32) -> (i32, i32, i32) {
    %c0_i32 = arith.constant 0 : i32
    %c0_i32_0 = arith.constant 0 : i32
    %c0_i32_1 = arith.constant 0 : i32
    return %arg0, %c0_i32, %c0_i32_0 : i32, i32, i32
  }
  func.func @transform_1(%arg0: i32) -> (i32, i32) {
    %c0_i32 = arith.constant 0 : i32
    %c0_i32_0 = arith.constant 0 : i32
    %c0_i32_1 = arith.constant 0 : i32
    return %c0_i32, %c0_i32_0 : i32, i32
  }
  func.func @transform_2(%arg0: i32) -> (i32, i32) {
    %c0_i32 = arith.constant 0 : i32
    %c0_i32_0 = arith.constant 0 : i32
    %c0_i32_1 = arith.constant 0 : i32
    return %c0_i32, %c0_i32_0 : i32, i32
  }
  func.func @transform_3(%arg0: i32) -> (i32, i32) {
    %c0_i32 = arith.constant 0 : i32
    %c0_i32_0 = arith.constant 0 : i32
    %c0_i32_1 = arith.constant 0 : i32
    return %c0_i32, %c0_i32_0 : i32, i32
  }
  func.func @transform_4(%arg0: i32) -> (i32, i32, i32) {
    %c0_i32 = arith.constant 0 : i32
    %c0_i32_0 = arith.constant 0 : i32
    %c0_i32_1 = arith.constant 0 : i32
    return %arg0, %c0_i32, %c0_i32_0 : i32, i32, i32
  }
  func.func @transform_5(%arg0: i32) -> (i32, i32, i32) {
    %c0_i32 = arith.constant 0 : i32
    %c0_i32_0 = arith.constant 0 : i32
    %c0_i32_1 = arith.constant 0 : i32
    return %arg0, %c0_i32, %c0_i32_0 : i32, i32, i32
  }
}

</mosaic_0001>

<bundles_post_ra>
// kernel: mixed_op_forward.1
= control target key start
LH: loop header
LB: loop body
LE: loop exit
PB: predicated region body
PF: predicated region fallthrough
CT: control target
= control target key end

     0   :  { %s690_s18 = smov 0   ;;  %s743_s0 = inlined_call_operand.vmem [shape: bf16[2,8,256], index: 0, kind: input, shape index: {}]   ;;  %s744_s1 = inlined_call_operand.vmem [shape: f32[8,4], index: 1, kind: input, shape index: {}]   ;;  %s745_s2 = inlined_call_operand.vmem [shape: f32[4,32], index: 2, kind: input, shape index: {}]   ;;  %s746_s3 = inlined_call_operand.vmem [shape: f32[32,8], index: 3, kind: input, shape index: {}]   ;;  %s747_s4 = inlined_call_operand.vmem [shape: bf16[2,8,256], index: 4, kind: output, shape index: {0}]   ;;  %s748_s5 = inlined_call_operand.vmem [shape: f32[2,1,32], index: 5, kind: output, shape index: {1}]  }
   0x1 LB: > { %s586_s19 = sadd.s32 4294967295, %s656_s18   ;;  %p590_p0 = scmp.ge.s32.totalorder %s656_s18, 1  ;;  %s656_s18 = sphi %s690_s18, %s16_s18  }
   0x2   : > { %p190_p1 = scmp.lt.s32.totalorder %s656_s18, 3 }
   0x4   : > { %p191_p2 = pnand %p590_p0, %p190_p1 }
   0x5   : > { %p221_p3 = scmp.lt.s32.totalorder (!%p191_p2), %s586_s19, 1 }
   0x6   : > { %194 = sbr.rel (%p191_p2) target bundleno = 896 (0x380), region = 36 }
   0xb   : > { %s750_s19 = smov (!%p221_p3, %s586_s19), 1  ;;  %v658_v4 = vmov 0.0   ;;  %v241_v5 = vld [vmem:[%s744_s1] sm:$0xff]  ;;  %vm659_vm0 = vmmov 0   ;;  %v243_v6 = vlaneseq  ;;  %vm249_vm1 = vcmask 64512   ;;  %v413_v17 = vld [vmem:[%s746_s3 + $0x18] sm:$0xff] }
   0xc   : > { %s603_s20 = sshll.u32 %s750_s19, 3  ;;  %615 = vmatprep.subr.mxu1 %v658_v4  ;;  %625 = vmatprep.subr.mxu0 %v658_v4  ;;  %v323_v13 = vld [vmem:[%s745_s2] sm:$0xf]  ;;  %vm328_vm2 = vcmask 1043456   ;;  %vm324_vm3 = vcmask 31744   ;;  %v412_v18 = vld [vmem:[%s746_s3 + $0x10] sm:$0xff]  ;;  %s233_s13 = scalar_lea.vmem %s748_s5, %s750_s19 }
   0xd   : > { %s225_s23 = scalar_lea.vmem %s743_s0, %s603_s20  ;;  %616 = vmatpush3.msra.mxu1 %v241_v5  ;;  %617 = vmatprep.mubr.msk.f32.mxu1 %vm659_vm0, %v658_v4  ;;  %v244_v7 = vand.u32 127, %v243_v6  ;;  %v246_v8 = vshrl.u32 %v243_v6, 7  ;;  %v411_v19 = vld [vmem:[%s746_s3 + $0x8] sm:$0xff]  ;;  %v410_v20 = vld [vmem:[%s746_s3] sm:$0xff]  ;;  %vm408_vm4 = vcmask 253952   ;;  %vm414_vm5 = vcmask 261120   ;;  %s230_s16 = scalar_lea.vmem %s747_s4, %s603_s20 }
   0xe   : > { %v706_v0 = vld [vmem:[%s225_s23] sm:$0xff]  ;;  %620 = vmatprep.subr.mxu1 %v658_v4  ;;  %633 = vmatprep.mubr.msk.f32.mxu0 %vm659_vm0, %v658_v4 }
   0xf   : > { %v235_v1 = vunpack.c.l.bf16 %v706_v0  ;;  %v236_v2 = vunpack.c.h.bf16 %v706_v0  ;;  %v247_v9 = vsub.s32 %v244_v7, %v246_v8  ;;  %626 = vmatpush3.msra.mxu0 %v413_v17  ;;  %v490_v27 = vsub.s32 0, %v246_v8 }
  0x10   : > { %627 = vmatprep.subr.mxu0 %v658_v4 }
  0x11   : > { %v237_v3 = vadd.f32 %v236_v2, %v235_v1  ;;  %628 = vmatpush3.msra.mxu0 %v412_v18 }
  0x12   : > { %629 = vmatprep.subr.mxu0 %v658_v4 }
  0x13   : > { %238 = vadd.xlane.f32.xlu0 %v237_v3  ;;  %630 = vmatpush3.msra.mxu0 %v411_v19 }
  0x14   : > { %631 = vmatprep.subr.mxu0 %v658_v4 }
  0x15   : > { %632 = vmatpush3.msra.mxu0 %v410_v20 }
  0x9c   : > { %v239_v10 = vpop.xlane.xlu0 %238 }
  0x9d   : > { %v240_v11 = vmul.f32 0.00390625, %v239_v10 }
  0x9f   : > { %v248_v12 = vrot.slane %v240_v11, %v247_v9 }
  0xa1   : > { %618 = vmatmul.mubr.msk.f32.vlgmr.msra.gmra.mxu1 %vm249_vm1, %v248_v12 }
  0xa2   : > { %621 = vmatpush3.msk.msra.mxu1 %vm328_vm2, %v323_v13  ;;  %622 = vmatprep.mubr.msk.f32.mxu1 %vm659_vm0, %v658_v4 }
 0x161   : > { %v318_v14 = vpop.f32.mrf.mxu1 }
 0x162   : > { %v322_v15 = vmax.f32 %v318_v14, 0.0 }
 0x163   : > { %v619_v16 = vpop.f32.mrf.mxu1 }
 0x164   : > { %623 = vmatmul.mubr.msk.f32.vlgmr.msra.gmra.mxu1 %vm324_vm3, %v322_v15 }
 0x224   : > { %v398_v21 = vpop.f32.mrf.mxu1 }
 0x225   : > { %v598_v22 = vmul.f32 -1.442695, %v398_v21 }
 0x226   : > { %v624_v23 = vpop.f32.mrf.mxu1 }
 0x227   : > { %646 = vpow2.f32 %v598_v22 }
 0x234   : > { %v647_v24 = vpop.eup %646 }
 0x235   : > { %v405_v25 = vadd.f32 1.0, %v647_v24 }
 0x237   : > { %648 = vrcp.f32 %v405_v25 }
 0x244   : > { %v649_v26 = vpop.eup %648 }
 0x245   : > { %409 = vst.msk [vmem:[%s233_s13] sm:$0x1] %vm408_vm4, %v649_v26  ;;  %634 = vmatmul.mubr.msk.f32.vlgmr.msra.gmra.mxu0 %vm414_vm5, %v649_v26 }
 0x305   : > { %v484_v28 = vpop.f32.mrf.mxu0 }
 0x306   : > { %v491_v29 = vrot.slane %v484_v28, %v490_v27 }
 0x307   : > { %v635_v30 = vpop.f32.mrf.mxu0 }
 0x308   : > { %493 = vbcast.lane.b32.xlu0 %v491_v29, 256 }
 0x37a   : > { %v494_v31 = vpop.permute.xlu0 %493 }
 0x37b   : > { %v495_v32 = vmul.f32 %v494_v31, %v235_v1  ;;  %v496_v33 = vmul.f32 %v494_v31, %v236_v2 }
 0x37d   : > { %v605_v34 = vpack.c.bf16 %v496_v33, %v495_v32 }
 0x37f   : > { %505 = vst [vmem:[%s230_s16] sm:$0xff] %v605_v34 }
 0x380 PF: > { %s16_s18 = sadd.s32 1, %s656_s18  }
 0x381   : > { %p13_p4 = scmp.ge.s32.totalorder %s16_s18, 4  }
 0x383   :  { %15 = sbr.rel (!%p13_p4) target bundleno = 1 (0x1), region = 78 }

</bundles_post_ra>
